<compile_context>
chip_gen: v5e
topology: v5e:2x2
jax: 0.10.0
libtpu: 0.0.40
codegen_flags: <defaults>
</compile_context>

<pallas_src>
import math

import jax
import jax.numpy as jnp
from jax.experimental import pallas as pl
from jax.experimental.pallas import tpu as pltpu

LANE = 128     # TPU lane width
SUBLANE = 8    # TPU sublane width


def _round_up(x, m):
    return (x + m - 1) // m * m


def policy_kernel(x_ref, w1_ref, w23_ref, w4_ref, b123_ref, b4std_ref,
                  noise_ref, action_ref):
    bf16 = jnp.bfloat16

    x = x_ref[...].astype(bf16)                                    # (Bt, S)

    # bf16 MXU matmuls with f32 accumulation; bias add + tanh in f32.
    h = jnp.tanh(jnp.dot(x, w1_ref[...],
                         preferred_element_type=jnp.float32) + b123_ref[0:1, :])
    h = jnp.tanh(jnp.dot(h.astype(bf16), w23_ref[0],
                         preferred_element_type=jnp.float32) + b123_ref[1:2, :])
    h = jnp.tanh(jnp.dot(h.astype(bf16), w23_ref[1],
                         preferred_element_type=jnp.float32) + b123_ref[2:3, :])
    mean = jnp.dot(h.astype(bf16), w4_ref[...],
                   preferred_element_type=jnp.float32) + b4std_ref[0:1, :]

    std = b4std_ref[1:2, :]                                        # (1, Ap), f32
    # Padded lanes: mean == 0 (zero weight cols / bias), noise == 0 -> action == 0.
    action_ref[...] = (mean + std * noise_ref[...]).astype(action_ref.dtype)


def policy_net_forward(state, params, noise, *, block_b=2048):
    """(action, log_prob) matching PolicyNet.forward(state, deterministic=False).

    state : (B, state_dim) float32
    noise : (B, action_dim) float32 standard-normal draws (the stochastic bit).
    """
    B, S = state.shape
    A = params["w4"].shape[1]
    H = params["w1"].shape[1]

    Hp = _round_up(H, LANE)        # hidden 50 -> 128 (lane-dense)
    Ap = _round_up(A, LANE)        # action  4 -> 128 (lane-dense)

    # Balanced batch tiling: big tiles (amortise ~0.35us/step), small remainder pad.
    n_tiles = max(1, pl.cdiv(B, block_b))
    Bt = _round_up(pl.cdiv(B, n_tiles), SUBLANE)
    Bp = Bt * n_tiles

    f32, bf16 = jnp.float32, jnp.bfloat16

    def pad2(a, rows, cols, dtype):
        a = jnp.asarray(a, f32)
        a = jnp.pad(a, ((0, rows - a.shape[0]), (0, cols - a.shape[1])))
        return a.astype(dtype)

    # Zero-padding is exact: padded weight rows/cols and biases are 0, padded
    # hidden lanes are tanh(0)=0 (exact in bf16 too), padded noise lanes are 0.
    w1 = pad2(params["w1"], S, Hp, bf16)                               # (S, Hp)
    w23 = jnp.stack([pad2(params["w2"], Hp, Hp, bf16),
                     pad2(params["w3"], Hp, Hp, bf16)])                # (2, Hp, Hp)
    w4 = pad2(params["w4"], Hp, Ap, bf16)                              # (Hp, Ap)
    b123 = jnp.concatenate([pad2(params["b1"], 1, Hp, f32),
                            pad2(params["b2"], 1, Hp, f32),
                            pad2(params["b3"], 1, Hp, f32)], axis=0)   # (3, Hp)
    std = jnp.exp(params["log_std"].astype(f32))                       # (1, A)
    b4std = jnp.concatenate([pad2(params["b4"], 1, Ap, f32),
                             pad2(std, 1, Ap, f32)], axis=0)           # (2, Ap)

    x = jnp.pad(state.astype(f32), ((0, Bp - B), (0, 0)))              # (Bp, S)
    nz = pad2(noise, Bp, Ap, f32)                                      # (Bp, Ap)

    def batch_spec(shape):      # tiled over the batch grid axis
        return pl.BlockSpec(shape, lambda i, _n=len(shape): (i,) + (0,) * (_n - 1))

    def resident(shape):        # same block every grid step -> stays in VMEM
        return pl.BlockSpec(shape, lambda i, _n=len(shape): (0,) * _n)

    action_p = pl.pallas_call(
        policy_kernel,
        out_shape=jax.ShapeDtypeStruct((Bp, Ap), f32),
        grid=(n_tiles,),
        in_specs=[batch_spec((Bt, S)),
                  resident((S, Hp)),
                  resident((2, Hp, Hp)),
                  resident((Hp, Ap)),
                  resident((3, Hp)),
                  resident((2, Ap)),
                  batch_spec((Bt, Ap))],
        out_specs=batch_spec((Bt, Ap)),
        compiler_params=pltpu.CompilerParams(
            dimension_semantics=("parallel",),      # megacore-shardable batch axis
            vmem_limit_bytes=32 << 20),             # safe on v7x (64 MiB) and v5e/v6e
    )(x, w1, w23, w4, b123, b4std, nz)

    # log_prob of a diagonal MVN evaluated at its own sample depends only on
    # (noise, log_std): (action - mean) / std == noise.  Compute on the
    # unpadded arrays in the wrapper -> no kernel output stream needed.
    logp = (-0.5 * jnp.sum(noise.astype(f32) ** 2, axis=-1)
            - jnp.sum(params["log_std"].astype(f32))
            - 0.5 * A * math.log(2.0 * math.pi))

    return action_p[:B, :A], logp


def init_params(key, state_dim, action_dim, hidden=50):
    """Deterministic synthetic init (PyTorch-Linear-like uniform ranges)."""
    ks = jax.random.split(key, 8)

    def linear(kw, kb, fan_in, fan_out):
        bound = 1.0 / math.sqrt(fan_in)
        w = jax.random.uniform(kw, (fan_in, fan_out), jnp.float32, -bound, bound)
        b = jax.random.uniform(kb, (1, fan_out), jnp.float32, -bound, bound)
        return w, b

    w1, b1 = linear(ks[0], ks[1], state_dim, hidden)
    w2, b2 = linear(ks[2], ks[3], hidden, hidden)
    w3, b3 = linear(ks[4], ks[5], hidden, hidden)
    w4, b4 = linear(ks[6], ks[7], hidden, action_dim)
    log_std = jnp.zeros((1, action_dim), jnp.float32)   # nn.Parameter(torch.zeros(A))
    return dict(w1=w1, b1=b1, w2=w2, b2=b2, w3=w3, b3=b3, w4=w4, b4=b4,
                log_std=log_std)


def policy_net_ref(state, params, noise):
    """Plain-JAX f32 reference for correctness check."""
    h = jnp.tanh(state @ params["w1"] + params["b1"])
    h = jnp.tanh(h @ params["w2"] + params["b2"])
    h = jnp.tanh(h @ params["w3"] + params["b3"])
    mean = h @ params["w4"] + params["b4"]
    log_std = params["log_std"]
    std = jnp.exp(log_std)
    action = mean + std * noise
    z = (action - mean) / std
    A = mean.shape[-1]
    logp = (-0.5 * jnp.sum(z * z, axis=-1)
            - jnp.sum(log_std)
            - 0.5 * A * math.log(2.0 * math.pi))
    return action, logp


if __name__ == "__main__":
    state_dim, action_dim, batch = 16, 4, 8

    key = jax.random.PRNGKey(0)
    k_params, k_state, k_noise = jax.random.split(key, 3)

    params = init_params(k_params, state_dim, action_dim)
    state = jax.random.normal(k_state, (batch, state_dim), jnp.float32)
    noise = jax.random.normal(k_noise, (batch, action_dim), jnp.float32)

    action, log_prob = jax.block_until_ready(
        policy_net_forward(state, params, noise))

    ref_action, ref_logp = policy_net_ref(state, params, noise)
    # bf16 matmuls (f32 accumulate) -> slightly loosened tolerance on action.
    assert jnp.allclose(action, ref_action, atol=5e-2, rtol=5e-2), "action mismatch"
    # logp path is exact f32 (noise-only), keep tight tolerance.
    assert jnp.allclose(log_prob, ref_logp, atol=1e-5, rtol=1e-4), "log_prob mismatch"

    print("KERNEL_OK")
</pallas_src>

<mosaic_0001>
module attributes {stable_mosaic.version = 11 : i64} {
  func.func @policy_kernel(%arg0: i32, %arg1: memref<8x16xf32, #tpu.memory_space<vmem>>, %arg2: memref<16x128xbf16, #tpu.memory_space<vmem>>, %arg3: memref<2x128x128xbf16, #tpu.memory_space<vmem>>, %arg4: memref<128x128xbf16, #tpu.memory_space<vmem>>, %arg5: memref<3x128xf32, #tpu.memory_space<vmem>>, %arg6: memref<2x128xf32, #tpu.memory_space<vmem>>, %arg7: memref<8x128xf32, #tpu.memory_space<vmem>>, %arg8: memref<8x128xf32, #tpu.memory_space<vmem>>) attributes {dimension_semantics = [#tpu.dimension_semantics<parallel>], iteration_bounds = array<i64: 1>, scalar_prefetch = 0 : i64, scratch_operands = 0 : i64, tpu.core_type = #tpu.core_type<tc>, window_params = [{transform_indices = @transform_0, window_bounds = array<i64: 8, 16>}, {pipeline_mode = #tpu.pipeline_mode<synchronous>, transform_indices = @transform_1, window_bounds = array<i64: 16, 128>}, {pipeline_mode = #tpu.pipeline_mode<synchronous>, transform_indices = @transform_2, window_bounds = array<i64: 2, 128, 128>}, {pipeline_mode = #tpu.pipeline_mode<synchronous>, transform_indices = @transform_3, window_bounds = array<i64: 128, 128>}, {pipeline_mode = #tpu.pipeline_mode<synchronous>, transform_indices = @transform_4, window_bounds = array<i64: 3, 128>}, {pipeline_mode = #tpu.pipeline_mode<synchronous>, transform_indices = @transform_5, window_bounds = array<i64: 2, 128>}, {transform_indices = @transform_6, window_bounds = array<i64: 8, 128>}, {transform_indices = @transform_7, window_bounds = array<i64: 8, 128>}]} {
    %c0 = arith.constant 0 : index
    %c0_0 = arith.constant 0 : index
    %0 = vector.load %arg1[%c0, %c0_0] : memref<8x16xf32, #tpu.memory_space<vmem>>, vector<8x16xf32>
    %1 = arith.truncf %0 : vector<8x16xf32> to vector<8x16xbf16>
    %c0_1 = arith.constant 0 : index
    %c0_2 = arith.constant 0 : index
    %2 = vector.load %arg2[%c0_1, %c0_2] : memref<16x128xbf16, #tpu.memory_space<vmem>>, vector<16x128xbf16>
    %cst = arith.constant dense<0.000000e+00> : vector<8x128xf32>
    %3 = tpu.matmul %1, %2, %cst {dimension_numbers = #tpu.dot_dimension_numbers<[1], [0], [0], [1], [0, 0, 1, 1], [], []>} : vector<8x16xbf16>, vector<16x128xbf16>, vector<8x128xf32> -> vector<8x128xf32>
    %c0_3 = arith.constant 0 : index
    %c0_4 = arith.constant 0 : index
    %4 = vector.load %arg5[%c0_3, %c0_4] : memref<3x128xf32, #tpu.memory_space<vmem>>, vector<1x128xf32>
    %5 = vector.broadcast %4 : vector<1x128xf32> to vector<8x128xf32>
    %6 = arith.addf %3, %5 : vector<8x128xf32>
    %7 = math.tanh %6 : vector<8x128xf32>
    %8 = arith.truncf %7 : vector<8x128xf32> to vector<8x128xbf16>
    %c0_5 = arith.constant 0 : index
    %c0_6 = arith.constant 0 : index
    %c0_7 = arith.constant 0 : index
    %9 = vector.load %arg3[%c0_5, %c0_6, %c0_7] : memref<2x128x128xbf16, #tpu.memory_space<vmem>>, vector<1x128x128xbf16>
    %10 = vector.shape_cast %9 : vector<1x128x128xbf16> to vector<128x128xbf16>
    %cst_8 = arith.constant dense<0.000000e+00> : vector<8x128xf32>
    %11 = tpu.matmul %8, %10, %cst_8 {dimension_numbers = #tpu.dot_dimension_numbers<[1], [0], [0], [1], [0, 0, 1, 1], [], []>} : vector<8x128xbf16>, vector<128x128xbf16>, vector<8x128xf32> -> vector<8x128xf32>
    %c1 = arith.constant 1 : index
    %c0_9 = arith.constant 0 : index
    %12 = vector.load %arg5[%c1, %c0_9] : memref<3x128xf32, #tpu.memory_space<vmem>>, vector<1x128xf32>
    %13 = vector.broadcast %12 : vector<1x128xf32> to vector<8x128xf32>
    %14 = arith.addf %11, %13 : vector<8x128xf32>
    %15 = math.tanh %14 : vector<8x128xf32>
    %16 = arith.truncf %15 : vector<8x128xf32> to vector<8x128xbf16>
    %c1_10 = arith.constant 1 : index
    %c0_11 = arith.constant 0 : index
    %c0_12 = arith.constant 0 : index
    %17 = vector.load %arg3[%c1_10, %c0_11, %c0_12] : memref<2x128x128xbf16, #tpu.memory_space<vmem>>, vector<1x128x128xbf16>
    %18 = vector.shape_cast %17 : vector<1x128x128xbf16> to vector<128x128xbf16>
    %cst_13 = arith.constant dense<0.000000e+00> : vector<8x128xf32>
    %19 = tpu.matmul %16, %18, %cst_13 {dimension_numbers = #tpu.dot_dimension_numbers<[1], [0], [0], [1], [0, 0, 1, 1], [], []>} : vector<8x128xbf16>, vector<128x128xbf16>, vector<8x128xf32> -> vector<8x128xf32>
    %c2 = arith.constant 2 : index
    %c0_14 = arith.constant 0 : index
    %20 = vector.load %arg5[%c2, %c0_14] : memref<3x128xf32, #tpu.memory_space<vmem>>, vector<1x128xf32>
    %21 = vector.broadcast %20 : vector<1x128xf32> to vector<8x128xf32>
    %22 = arith.addf %19, %21 : vector<8x128xf32>
    %23 = math.tanh %22 : vector<8x128xf32>
    %24 = arith.truncf %23 : vector<8x128xf32> to vector<8x128xbf16>
    %c0_15 = arith.constant 0 : index
    %c0_16 = arith.constant 0 : index
    %25 = vector.load %arg4[%c0_15, %c0_16] : memref<128x128xbf16, #tpu.memory_space<vmem>>, vector<128x128xbf16>
    %cst_17 = arith.constant dense<0.000000e+00> : vector<8x128xf32>
    %26 = tpu.matmul %24, %25, %cst_17 {dimension_numbers = #tpu.dot_dimension_numbers<[1], [0], [0], [1], [0, 0, 1, 1], [], []>} : vector<8x128xbf16>, vector<128x128xbf16>, vector<8x128xf32> -> vector<8x128xf32>
    %c0_18 = arith.constant 0 : index
    %c0_19 = arith.constant 0 : index
    %27 = vector.load %arg6[%c0_18, %c0_19] : memref<2x128xf32, #tpu.memory_space<vmem>>, vector<1x128xf32>
    %28 = vector.broadcast %27 : vector<1x128xf32> to vector<8x128xf32>
    %29 = arith.addf %26, %28 : vector<8x128xf32>
    %c1_20 = arith.constant 1 : index
    %c0_21 = arith.constant 0 : index
    %30 = vector.load %arg6[%c1_20, %c0_21] : memref<2x128xf32, #tpu.memory_space<vmem>>, vector<1x128xf32>
    %c0_22 = arith.constant 0 : index
    %c0_23 = arith.constant 0 : index
    %31 = vector.load %arg7[%c0_22, %c0_23] : memref<8x128xf32, #tpu.memory_space<vmem>>, vector<8x128xf32>
    %32 = vector.broadcast %30 : vector<1x128xf32> to vector<8x128xf32>
    %33 = arith.mulf %32, %31 : vector<8x128xf32>
    %34 = arith.addf %29, %33 : vector<8x128xf32>
    %c0_24 = arith.constant 0 : index
    %c0_25 = arith.constant 0 : index
    %35 = vector.load %arg8[%c0_24, %c0_25] : memref<8x128xf32, #tpu.memory_space<vmem>>, vector<8x128xf32>
    tpu.vector_store %arg8[%c0_24, %c0_25], %34 {strides = array<i32>} : memref<8x128xf32, #tpu.memory_space<vmem>>, vector<8x128xf32>,
    return
  }
  func.func @transform_0(%arg0: i32) -> (i32, i32) {
    %c0_i32 = arith.constant 0 : i32
    %c0_i32_0 = arith.constant 0 : i32
    return %arg0, %c0_i32 : i32, i32
  }
  func.func @transform_1(%arg0: i32) -> (i32, i32) {
    %c0_i32 = arith.constant 0 : i32
    %c0_i32_0 = arith.constant 0 : i32
    %c0_i32_1 = arith.constant 0 : i32
    return %c0_i32, %c0_i32_0 : i32, i32
  }
  func.func @transform_2(%arg0: i32) -> (i32, i32, i32) {
    %c0_i32 = arith.constant 0 : i32
    %c0_i32_0 = arith.constant 0 : i32
    %c0_i32_1 = arith.constant 0 : i32
    %c0_i32_2 = arith.constant 0 : i32
    return %c0_i32, %c0_i32_0, %c0_i32_1 : i32, i32, i32
  }
  func.func @transform_3(%arg0: i32) -> (i32, i32) {
    %c0_i32 = arith.constant 0 : i32
    %c0_i32_0 = arith.constant 0 : i32
    %c0_i32_1 = arith.constant 0 : i32
    return %c0_i32, %c0_i32_0 : i32, i32
  }
  func.func @transform_4(%arg0: i32) -> (i32, i32) {
    %c0_i32 = arith.constant 0 : i32
    %c0_i32_0 = arith.constant 0 : i32
    %c0_i32_1 = arith.constant 0 : i32
    return %c0_i32, %c0_i32_0 : i32, i32
  }
  func.func @transform_5(%arg0: i32) -> (i32, i32) {
    %c0_i32 = arith.constant 0 : i32
    %c0_i32_0 = arith.constant 0 : i32
    %c0_i32_1 = arith.constant 0 : i32
    return %c0_i32, %c0_i32_0 : i32, i32
  }
  func.func @transform_6(%arg0: i32) -> (i32, i32) {
    %c0_i32 = arith.constant 0 : i32
    %c0_i32_0 = arith.constant 0 : i32
    return %arg0, %c0_i32 : i32, i32
  }
  func.func @transform_7(%arg0: i32) -> (i32, i32) {
    %c0_i32 = arith.constant 0 : i32
    %c0_i32_0 = arith.constant 0 : i32
    return %arg0, %c0_i32 : i32, i32
  }
}

</mosaic_0001>

<bundles_post_ra>
// kernel: tpu_custom_call.1
= control target key start
LH: loop header
LB: loop body
LE: loop exit
PB: predicated region body
PF: predicated region fallthrough
CT: control target
= control target key end

     0   :  { %12 = vsyncpa [#allocation3], 0  ;;  %s815_s0 = inlined_call_operand.hbm [shape: f32[8,16], index: 0, kind: input, shape index: {}]   ;;  %s816_s1 = inlined_call_operand.hbm [shape: bf16[16,128], index: 1, kind: input, shape index: {}]   ;;  %s817_s2 = inlined_call_operand.hbm [shape: bf16[2,128,128], index: 2, kind: input, shape index: {}]   ;;  %s818_s3 = inlined_call_operand.hbm [shape: bf16[128,128], index: 3, kind: input, shape index: {}]   ;;  %s819_s4 = inlined_call_operand.hbm [shape: f32[3,128], index: 4, kind: input, shape index: {}]   ;;  %s820_s5 = inlined_call_operand.vmem [shape: f32[2,128], index: 5, kind: input, shape index: {}]   ;;  %s821_s6 = inlined_call_operand.hbm [shape: f32[8,128], index: 6, kind: input, shape index: {}]   ;;  %s822_s7 = inlined_call_operand.hbm [shape: f32[8,128], index: 7, kind: output, shape index: {}]  }
   0x1   :  { %13 = vsyncpa [#allocation6], 0 }
   0x2   :  { %14 = vsyncpa [#allocation9], 0 }
   0x3   :  { %15 = vsyncpa [#allocation12], 0  ;;  %s32_s26 = sshll.u32 %s816_s1, 4  ;;  %s33_s26 = int_to_ptr.hbm [resolvable:$true] %s32_s26 }
   0x4   :  { %16 = vsyncpa [#allocation4], 0  ;;  %s739_s27 = smov [#allocation5]   ;;  %s58_s8 = sshll.u32 %s818_s3, 4  ;;  %s59_s8 = int_to_ptr.hbm [resolvable:$true] %s58_s8 }
   0x5   :  { %s34_s28 = sshll.u32 %s739_s27, 4  ;;  %s740_s9 = smov 64   ;;  %s35_s28 = int_to_ptr.vmem [resolvable:$true] %s34_s28 }
   0x6   :  { %s741_s10 = smov 4   ;;  %s742_s11 = smov [#allocation8]  }
   0x7   :  { %40 = dma.hbm_to_vmem [thread:$0]  %s33_s26, 128, %s35_s28, [#allocation6], %s740_s9, %s740_s9, %s741_s10  }
   0x8   :  { %s60_s12 = sshll.u32 %s742_s11, 4  ;;  %s22_s15 = sshll.u32 %s815_s0, 4  ;;  %s61_s12 = int_to_ptr.vmem [resolvable:$true] %s60_s12  ;;  %s23_s15 = int_to_ptr.hbm [resolvable:$true] %s22_s15 }
   0x9   :  { %66 = dma.hbm_to_vmem [thread:$0]  %s59_s8, 1024, %s61_s12, [#allocation9], %s740_s9, %s740_s9, %s741_s10  }
   0xa   :  { %s45_s17 = sshll.u32 %s817_s2, 4  ;;  %s743_s18 = smov [#allocation2]   ;;  %s46_s17 = int_to_ptr.hbm [resolvable:$true] %s45_s17 }
   0xb   :  { %s24_s19 = sshll.u32 %s743_s18, 4  ;;  %s744_s3 = smov [#allocation7]   ;;  %s25_s19 = int_to_ptr.vmem [resolvable:$true] %s24_s19 }
   0xc   :  { %27 = dma.hbm_to_vmem [thread:$0]  %s23_s15, 128, %s25_s19, [#allocation3]  }
   0xd   :  { %s47_s20 = sshll.u32 %s744_s3, 4  ;;  %s72_s23 = sshll.u32 %s819_s4, 4  ;;  %s48_s20 = int_to_ptr.vmem [resolvable:$true] %s47_s20  ;;  %s73_s23 = int_to_ptr.hbm [resolvable:$true] %s72_s23 }
   0xe   :  { %53 = dma.hbm_to_vmem [thread:$0]  %s46_s17, 2048, %s48_s20, [#allocation6], %s740_s9, %s740_s9, %s741_s10  }
   0xf   :  { %s85_s25 = sshll.u32 %s821_s6, 4  ;;  %s745_s26 = smov [#allocation10]   ;;  %s86_s25 = int_to_ptr.hbm [resolvable:$true] %s85_s25 }
  0x10   :  { %s74_s2 = sshll.u32 %s745_s26, 4  ;;  %s746_s27 = smov [#allocation11]   ;;  %s75_s2 = int_to_ptr.vmem [resolvable:$true] %s74_s2 }
  0x11   :  { %77 = dma.hbm_to_vmem [thread:$0]  %s73_s23, 64, %s75_s2, [#allocation9]  }
  0x12   :  { %s87_s28 = sshll.u32 %s746_s27, 4  ;;  %s88_s28 = int_to_ptr.vmem [resolvable:$true] %s87_s28 }
  0x13   :  { %90 = dma.hbm_to_vmem [thread:$0]  %s86_s25, 128, %s88_s28, [#allocation12]  }
  0x14   :  { %729 = dma.done.wait [#allocation3], 128  }
  0x15   :  { %730 = vsyncadd [#allocation3], 4294967168 }
  0x16   :  { %731 = dma.done.wait [#allocation6], 2176  }
  0x17   :  { %732 = vsyncadd [#allocation6], 4294965120 }
  0x18   :  { %733 = dma.done.wait [#allocation9], 1088  }
  0x19   :  { %734 = vsyncadd [#allocation9], 4294966208 }
  0x1a   :  { %735 = dma.done.wait [#allocation12], 128  }
  0x1b   :  { %736 = vsyncadd [#allocation12], 4294967168  ;;  %v516_v0 = vld [vmem:[#allocation5] sm:$0xff]  ;;  %v116_v1 = vld [vmem:[#allocation2] sm:$0xff]  ;;  %vm128_vm0 = vcmask 130048   ;;  %s747_s8 = smov [#allocation13]  }
  0x1c   :  { %v524_v2 = vld [vmem:[#allocation7 + $0x38] sm:$0xff]  ;;  %v117_v3 = vpack.c.bf16 %v116_v1, %v116_v1  ;;  %139 = vmatpush.bf16.msra.mxu0 %v516_v0  ;;  %v523_v4 = vld [vmem:[#allocation7 + $0x30] sm:$0xff]  ;;  %v522_v5 = vld [vmem:[#allocation7 + $0x28] sm:$0xff]  ;;  %s400_s9 = sshll.u32 %s747_s8, 4  ;;  %s402_s12 = sshll.u32 %s822_s7, 4  ;;  %s401_s9 = int_to_ptr.vmem [resolvable:$true] %s400_s9  ;;  %s403_s12 = int_to_ptr.hbm [resolvable:$true] %s402_s12 }
  0x1d   :  { %213 = vmatpush.bf16.msra.mxu1 %v524_v2  ;;  %v521_v6 = vld [vmem:[#allocation7 + $0x20] sm:$0xff]  ;;  %v520_v7 = vld [vmem:[#allocation7 + $0x18] sm:$0xff]  ;;  %v519_v8 = vld [vmem:[#allocation7 + $0x10] sm:$0xff] }
  0x1e   :  { %v518_v9 = vld [vmem:[#allocation7 + $0x8] sm:$0xff]  ;;  %v517_v10 = vld [vmem:[#allocation7] sm:$0xff]  ;;  %v532_v11 = vld [vmem:[#allocation7 + $0x78] sm:$0xff] }
  0x1f   :  { %419 = vmatmul.msk.bf16.vlgmr.msra.gmra.mxu0 %vm128_vm0, %v117_v3  ;;  %295 = vmatpush.bf16.msra.mxu2 %v532_v11  ;;  %v531_v12 = vld [vmem:[#allocation7 + $0x70] sm:$0xff]  ;;  %v530_v13 = vld [vmem:[#allocation7 + $0x68] sm:$0xff]  ;;  %v529_v14 = vld [vmem:[#allocation7 + $0x60] sm:$0xff] }
  0x20   :  { %v528_v15 = vld [vmem:[#allocation7 + $0x58] sm:$0xff]  ;;  %v550_v16 = vld [vmem:[#allocation10] ss:$0 sm:$0xff]  ;;  %v527_v22 = vld [vmem:[#allocation7 + $0x50] sm:$0xff] }
  0x21   :  { %214 = vmatpush.bf16.msra.mxu1 %v523_v4  ;;  %v526_v23 = vld [vmem:[#allocation7 + $0x48] sm:$0xff]  ;;  %v525_v24 = vld [vmem:[#allocation7 + $0x40] sm:$0xff]  ;;  %v540_v25 = vld [vmem:[#allocation8 + $0x38] sm:$0xff] }
  0x22   :  { %376 = vmatpush.bf16.msra.mxu3 %v540_v25  ;;  %v539_v26 = vld [vmem:[#allocation8 + $0x30] sm:$0xff]  ;;  %v538_v27 = vld [vmem:[#allocation8 + $0x28] sm:$0xff]  ;;  %v537_v28 = vld [vmem:[#allocation8 + $0x20] sm:$0xff] }
  0x23   :  { %296 = vmatpush.bf16.msra.mxu2 %v531_v12  ;;  %v536_v29 = vld [vmem:[#allocation8 + $0x18] sm:$0xff]  ;;  %v551_v30 = vld [vmem:[#allocation10 + $0x1] ss:$0 sm:$0xff]  ;;  %v535_v36 = vld [vmem:[#allocation8 + $0x10] sm:$0xff] }
  0x24   :  { %v534_v37 = vld [vmem:[#allocation8 + $0x8] sm:$0xff]  ;;  %v533_v38 = vld [vmem:[#allocation8] sm:$0xff]  ;;  %v554_v45 = vld [vmem:[%s820_s5 + $0x1] ss:$0 sm:$0xff] }
  0x25   :  { %215 = vmatpush.bf16.msra.mxu1 %v522_v5  ;;  %v552_v39 = vld [vmem:[#allocation10 + $0x2] ss:$0 sm:$0xff]  ;;  %v390_v46 = vld [vmem:[#allocation11] sm:$0xff]  ;;  %v553_v47 = vld [vmem:[%s820_s5] ss:$0 sm:$0xff] }
  0x26   :  { %377 = vmatpush.bf16.msra.mxu3 %v539_v26  ;;  %v392_v48 = vmul.f32 %v554_v45, %v390_v46 }
  0x27   :  { %297 = vmatpush.bf16.msra.mxu2 %v530_v13 }
  0x29   :  { %216 = vmatpush.bf16.msra.mxu1 %v521_v6 }
  0x2a   :  { %378 = vmatpush.bf16.msra.mxu3 %v538_v27 }
  0x2b   :  { %298 = vmatpush.bf16.msra.mxu2 %v529_v14 }
  0x2d   :  { %217 = vmatpush.bf16.msra.mxu1 %v520_v7 }
  0x2e   :  { %379 = vmatpush.bf16.msra.mxu3 %v537_v28 }
  0x2f   :  { %299 = vmatpush.bf16.msra.mxu2 %v528_v15 }
  0x31   :  { %218 = vmatpush.bf16.msra.mxu1 %v519_v8 }
  0x32   :  { %380 = vmatpush.bf16.msra.mxu3 %v536_v29 }
  0x33   :  { %300 = vmatpush.bf16.msra.mxu2 %v527_v22 }
  0x35   :  { %219 = vmatpush.bf16.msra.mxu1 %v518_v9 }
  0x36   :  { %381 = vmatpush.bf16.msra.mxu3 %v535_v36 }
  0x37   :  { %301 = vmatpush.bf16.msra.mxu2 %v526_v23 }
  0x39   :  { %220 = vmatpush.bf16.msra.mxu1 %v517_v10 }
  0x3a   :  { %382 = vmatpush.bf16.msra.mxu3 %v534_v37 }
  0x3b   :  { %302 = vmatpush.bf16.msra.mxu2 %v525_v24 }
  0x3e   :  { %383 = vmatpush.bf16.msra.mxu3 %v533_v38 }
  0x9c   :  { %v141_v17 = vpop.f32.mrf.mxu0 }
  0x9d   :  { %v142_v18 = vadd.f32 %v550_v16, %v141_v17 }
  0x9f   :  { %555 = vtanh.f32 %v142_v18 }
  0xa4   :  { %v143_v19 = vpop.f32.mrf.mxu0 }
  0xa5   :  { %v556_v20 = vpop.eup %555 }
  0xa6   :  { %v146_v21 = vpack.c.bf16 %v556_v20, %v556_v20 }
  0xa8   :  { %221 = vmatmul.bf16.vlgmr.msra.gmra.mxu1 %v146_v21 }
 0x125   :  { %v222_v31 = vpop.f32.mrf.mxu1 }
 0x126   :  { %v223_v32 = vadd.f32 %v551_v30, %v222_v31 }
 0x128   :  { %557 = vtanh.f32 %v223_v32 }
 0x12d   :  { %v224_v33 = vpop.f32.mrf.mxu1 }
 0x12e   :  { %v558_v34 = vpop.eup %557 }
 0x12f   :  { %v227_v35 = vpack.c.bf16 %v558_v34, %v558_v34 }
 0x131   :  { %303 = vmatmul.bf16.vlgmr.msra.gmra.mxu2 %v227_v35 }
 0x1b4   :  { %v304_v40 = vpop.f32.mrf.mxu2 }
 0x1b5   :  { %v305_v41 = vadd.f32 %v552_v39, %v304_v40 }
 0x1b7   :  { %559 = vtanh.f32 %v305_v41 }
 0x1bc   :  { %v306_v42 = vpop.f32.mrf.mxu2 }
 0x1bd   :  { %v560_v43 = vpop.eup %559 }
 0x1be   :  { %v309_v44 = vpack.c.bf16 %v560_v43, %v560_v43 }
 0x1c0   :  { %384 = vmatmul.bf16.vlgmr.msra.gmra.mxu3 %v309_v44 }
 0x243   :  { %v385_v49 = vpop.f32.mrf.mxu3 }
 0x244   :  { %v386_v50 = vadd.f32 %v553_v47, %v385_v49 }
 0x246   :  { %v393_v51 = vadd.f32 %v392_v48, %v386_v50 }
 0x248   :  { %394 = vst [vmem:[#allocation13] sm:$0xff] %v393_v51 }
 0x249   :  { %405 = dma.vmem_to_hbm [thread:$0]  %s401_s9, 128, %s403_s12, [#allocation4]  }
 0x24b   :  { %v387_v52 = vpop.f32.mrf.mxu3 }
 0x24c   :  { %737 = dma.done.wait [#allocation4], 128  }
 0x24d   :  { %738 = vsyncadd [#allocation4], 4294967168 }
 0x24e   :  { %410 = vsyncpa [#allocation3], 1 }
 0x24f   :  { %411 = vsyncpa [#allocation6], 1 }
 0x250   :  { %412 = vsyncpa [#allocation9], 1 }
 0x251   :  { %413 = vsyncpa [#allocation12], 1 }
 0x252   :  { %414 = vsyncpa [#allocation4], 1 }

</bundles_post_ra>
